<compile_context>
chip_gen: v5e
topology: v5e:2x2
jax: 0.10.0
libtpu: 0.0.40
codegen_flags: <defaults>
</compile_context>

<pallas_src>
import jax
import jax.numpy as jnp
from jax.experimental import pallas as pl
from jax.experimental.pallas import tpu as pltpu


# ---------------- Pallas kernel (fused forward) ----------------

def _fused_kernel(x_ref, w_ref, b1_ref, w2_ref, b2_ref, o_ref):
    # x : [TB, D]   bf16 (D = win_num * t_feature_dim)
    # w : [D, Hp]   bf16, pre-transposed, embedding folded in, H zero-padded to Hp
    # b1: [1, Hp]   f32 folded bias (zero in padded columns)
    # w2: [1, Hp]   f32 fc2 weight row (zero in padded columns)
    # b2: [1]       f32 fc2 bias (SMEM scalar)
    # o : [1, 1, TB] f32 lane-dense output row
    h = jnp.dot(x_ref[...], w_ref[...],
                preferred_element_type=jnp.float32) + b1_ref[...]
    h = jnp.maximum(h, 0.0)                                        # ReLU (f32)
    # width-1 output: broadcast-multiply + lane reduce instead of an MXU matmul
    y = jnp.sum(h * w2_ref[...], axis=-1, keepdims=True) + b2_ref[0]   # [TB, 1]
    # Softplus (torch.nn.Softplus, beta=1, threshold=20)
    y = jnp.where(y > 20.0, y, jnp.log1p(jnp.exp(jnp.minimum(y, 20.0))))
    # lane-dense store: [TB, 1] column -> [1, 1, TB] row (XLU relayout, cheap)
    o_ref[...] = y.reshape(1, 1, -1)


# ---------------- parameter folding (one-time, host/XLA side) ----------------

def _round_up(x, m):
    return (x + m - 1) // m * m


def fold_params(params, *, win_num, t_feature_dim, emb_dim, lane=128):
    """Fold the t-embedding Linear into fc1 and pad hidden dim to the lane boundary."""
    wt, bt = params["wt"], params["bt"]            # [E, F], [E]
    w1, b1 = params["w1"], params["b1"]            # [H, win*E], [H]
    H = w1.shape[0]
    w1_blocks = w1.reshape(H, win_num, emb_dim)    # [H, win, E]
    # W_eff[h, w, f] = sum_e w1[h, w, e] * wt[e, f]
    w_eff = jnp.einsum("hwe,ef->hwf", w1_blocks, wt).reshape(H, win_num * t_feature_dim)
    b_eff = b1 + jnp.einsum("hwe,e->h", w1_blocks, bt)
    w2 = params["w2"].reshape(H)

    # zero-pad hidden dim to 128 lanes: padded h = relu(0) = 0 and padded w2 = 0,
    # so the epilogue reduce is unchanged while all vregs are full-width.
    Hp = _round_up(H, lane)
    if Hp != H:
        w_eff = jnp.pad(w_eff, ((0, Hp - H), (0, 0)))
        b_eff = jnp.pad(b_eff, ((0, Hp - H),))
        w2 = jnp.pad(w2, ((0, Hp - H),))

    return {
        "w_eff_t": w_eff.T.astype(jnp.bfloat16),   # [D, Hp] bf16 MXU operand
        "b_eff": b_eff.reshape(1, Hp).astype(jnp.float32),
        "w2": w2.reshape(1, Hp).astype(jnp.float32),
        "b2": params["b2"].reshape(1).astype(jnp.float32),   # SMEM scalar
    }


# ---------------- tile selection ----------------

def _choose_tile(B, *, tb_max=4096, min_tiles=2):
    """Pick (TB rows per grid step, padded batch B_pad).

    Prefers >= min_tiles grid steps (so the 'parallel' batch axis can use both
    v7x TensorCores) and a TB that divides B exactly (avoids an extra HBM copy
    of x from jnp.pad).  TB is always a multiple of 8, capped at tb_max.
    """
    if B < 8 * min_tiles:
        TB = _round_up(max(B, 1), 8)
        return TB, TB
    target = min(tb_max, _round_up(-(-B // min_tiles), 8))
    cand = target
    while cand >= 8 and target - cand <= 256:      # short search for an exact divisor
        if B % cand == 0:
            return cand, B
        cand -= 8
    return target, _round_up(B, target)


# ---------------- wrapper ----------------

def linear_model_forward(xt, folded, *, tb_max=4096, min_tiles=2):
    """xt: [B, win_num * t_feature_dim] -> [B] prediction (single fused kernel)."""
    B, D = xt.shape
    w_eff_t = folded["w_eff_t"]                    # [D, Hp] bf16
    b_eff = folded["b_eff"]                        # [1, Hp] f32
    w2 = folded["w2"]                              # [1, Hp] f32
    b2 = folded["b2"]                              # [1]     f32
    Hp = w_eff_t.shape[1]
    assert w_eff_t.shape[0] == D

    TB, B_pad = _choose_tile(B, tb_max=tb_max, min_tiles=min_tiles)
    num_tiles = B_pad // TB

    x = xt.astype(jnp.bfloat16)                    # halve HBM traffic of streamed x
    if B_pad != B:                                 # only for tiny / ragged batches
        x = jnp.pad(x, ((0, B_pad - B), (0, 0)))

    out = pl.pallas_call(
        _fused_kernel,
        out_shape=jax.ShapeDtypeStruct((num_tiles, 1, TB), jnp.float32),
        grid_spec=pltpu.PrefetchScalarGridSpec(
            num_scalar_prefetch=0,
            grid=(num_tiles,),
            in_specs=[
                pl.BlockSpec((TB, D), lambda i: (i, 0)),        # batch-tiled activations
                pl.BlockSpec((D, Hp), lambda i: (0, 0)),        # VMEM-resident fused weight
                pl.BlockSpec((1, Hp), lambda i: (0, 0)),        # VMEM-resident fused bias
                pl.BlockSpec((1, Hp), lambda i: (0, 0)),        # VMEM-resident fc2 weight row
                pl.BlockSpec(memory_space=pltpu.MemorySpace.SMEM),  # fc2 bias scalar
            ],
            out_specs=pl.BlockSpec((1, 1, TB), lambda i: (i, 0, 0)),  # lane-dense rows
        ),
        compiler_params=pltpu.CompilerParams(
            dimension_semantics=("parallel",),      # shard batch tiles across TCs (v7x)
            # TODO(synk): raise vmem_limit_bytes here if TB is pushed past ~8K f32
            # rows on v6e; keep headroom on v7x (64 MiB physical VMEM).
        ),
    )(x, w_eff_t, b_eff, w2, b2)

    return out.reshape(-1)[:B]


# ---------------- deterministic parameter init (nn.Linear-style) ----------------

def init_params(key, win_num, t_feature_dim, emb_dim, hidden_dim):
    ks = jax.random.split(key, 6)
    D = win_num * emb_dim

    def uniform(k, shape, fan_in):
        bound = 1.0 / jnp.sqrt(fan_in)
        return jax.random.uniform(k, shape, jnp.float32, -bound, bound)

    return {
        "wt": uniform(ks[0], (emb_dim, t_feature_dim), t_feature_dim),
        "bt": uniform(ks[1], (emb_dim,), t_feature_dim),
        "w1": uniform(ks[2], (hidden_dim, D), D),
        "b1": uniform(ks[3], (hidden_dim,), D),
        "w2": uniform(ks[4], (1, hidden_dim), hidden_dim),
        "b2": uniform(ks[5], (1,), hidden_dim),
    }


# ---------------- main ----------------

if __name__ == "__main__":
    B = 2
    WIN_NUM = 8
    T_FEATURE_DIM = 32
    EMB_DIM = 16
    HIDDEN_DIM = 32

    key = jax.random.PRNGKey(0)
    kx, kp = jax.random.split(key)

    xt = jax.random.normal(kx, (B, WIN_NUM * T_FEATURE_DIM), jnp.float32)
    params = init_params(kp, WIN_NUM, T_FEATURE_DIM, EMB_DIM, HIDDEN_DIM)
    folded = fold_params(
        params, win_num=WIN_NUM, t_feature_dim=T_FEATURE_DIM, emb_dim=EMB_DIM
    )

    pred = linear_model_forward(xt, folded)
    jax.block_until_ready(pred)

    # reference check: original (unfolded) math in plain f32 JAX
    ref_emb = xt.reshape(B * WIN_NUM, T_FEATURE_DIM) @ params["wt"].T + params["bt"]
    ref_in = ref_emb.reshape(B, WIN_NUM * EMB_DIM)
    ref_h = jnp.maximum(ref_in @ params["w1"].T + params["b1"], 0.0)
    ref_y = ref_h @ params["w2"].T + params["b2"]
    ref = jnp.where(
        ref_y > 20.0, ref_y, jnp.log1p(jnp.exp(jnp.minimum(ref_y, 20.0)))
    ).reshape(-1)

    assert pred.shape == (B,)
    # bf16 MXU operands (f32 accumulation/epilogue) -> loosened tolerance
    assert jnp.allclose(pred, ref, atol=3e-2, rtol=3e-2), (pred, ref)

    print("KERNEL_OK")
</pallas_src>

<mosaic_0001>
module attributes {stable_mosaic.version = 11 : i64} {
  func.func @_fused_kernel(%arg0: i32, %arg1: memref<8x256xbf16, #tpu.memory_space<vmem>>, %arg2: memref<256x128xbf16, #tpu.memory_space<vmem>>, %arg3: memref<1x128xf32, #tpu.memory_space<vmem>>, %arg4: memref<1x128xf32, #tpu.memory_space<vmem>>, %arg5: memref<1xf32, #tpu.memory_space<smem>>, %arg6: memref<1x1x8xf32, #tpu.memory_space<vmem>>) attributes {dimension_semantics = [#tpu.dimension_semantics<parallel>], iteration_bounds = array<i64: 1>, scalar_prefetch = 0 : i64, scratch_operands = 0 : i64, tpu.core_type = #tpu.core_type<tc>, window_params = [{transform_indices = @transform_0, window_bounds = array<i64: 8, 256>}, {pipeline_mode = #tpu.pipeline_mode<synchronous>, transform_indices = @transform_1, window_bounds = array<i64: 256, 128>}, {pipeline_mode = #tpu.pipeline_mode<synchronous>, transform_indices = @transform_2, window_bounds = array<i64: 1, 128>}, {pipeline_mode = #tpu.pipeline_mode<synchronous>, transform_indices = @transform_3, window_bounds = array<i64: 1, 128>}, {transform_indices = @transform_4, window_bounds = array<i64: 1>}, {transform_indices = @transform_5, window_bounds = array<i64: 1, 1, 8>}]} {
    %c0 = arith.constant 0 : index
    %c0_0 = arith.constant 0 : index
    %0 = vector.load %arg1[%c0, %c0_0] : memref<8x256xbf16, #tpu.memory_space<vmem>>, vector<8x256xbf16>
    %c0_1 = arith.constant 0 : index
    %c0_2 = arith.constant 0 : index
    %1 = vector.load %arg2[%c0_1, %c0_2] : memref<256x128xbf16, #tpu.memory_space<vmem>>, vector<256x128xbf16>
    %cst = arith.constant dense<0.000000e+00> : vector<8x128xf32>
    %2 = tpu.matmul %0, %1, %cst {dimension_numbers = #tpu.dot_dimension_numbers<[1], [0], [0], [1], [0, 0, 1, 1], [], []>} : vector<8x256xbf16>, vector<256x128xbf16>, vector<8x128xf32> -> vector<8x128xf32>
    %c0_3 = arith.constant 0 : index
    %c0_4 = arith.constant 0 : index
    %3 = vector.load %arg3[%c0_3, %c0_4] : memref<1x128xf32, #tpu.memory_space<vmem>>, vector<1x128xf32>
    %4 = vector.broadcast %3 : vector<1x128xf32> to vector<8x128xf32>
    %5 = arith.addf %2, %4 : vector<8x128xf32>
    %cst_5 = arith.constant 0.000000e+00 : f32
    %6 = vector.broadcast %cst_5 : f32 to vector<8x128xf32>
    %7 = arith.maximumf %5, %6 : vector<8x128xf32>
    %c0_6 = arith.constant 0 : index
    %c0_7 = arith.constant 0 : index
    %8 = vector.load %arg4[%c0_6, %c0_7] : memref<1x128xf32, #tpu.memory_space<vmem>>, vector<1x128xf32>
    %9 = vector.broadcast %8 : vector<1x128xf32> to vector<8x128xf32>
    %10 = arith.mulf %7, %9 : vector<8x128xf32>
    %cst_8 = arith.constant dense<0.000000e+00> : vector<8xf32>
    %11 = vector.multi_reduction <add>, %10, %cst_8 [1] : vector<8x128xf32> to vector<8xf32>
    %12 = vector.shape_cast %11 : vector<8xf32> to vector<8x1xf32>
    %c0_9 = arith.constant 0 : index
    %13 = memref.load %arg5[%c0_9] : memref<1xf32, #tpu.memory_space<smem>>
    %14 = vector.broadcast %13 : f32 to vector<8x1xf32>
    %15 = arith.addf %12, %14 : vector<8x1xf32>
    %cst_10 = arith.constant 2.000000e+01 : f32
    %16 = vector.broadcast %cst_10 : f32 to vector<8x1xf32>
    %17 = arith.cmpf ogt, %15, %16 : vector<8x1xf32>
    %cst_11 = arith.constant 2.000000e+01 : f32
    %18 = vector.broadcast %cst_11 : f32 to vector<8x1xf32>
    %19 = arith.minimumf %15, %18 : vector<8x1xf32>
    %20 = math.exp %19 : vector<8x1xf32>
    %21 = math.log1p %20 : vector<8x1xf32>
    %22 = arith.select %17, %15, %21 : vector<8x1xi1>, vector<8x1xf32>
    %23 = vector.shape_cast %22 : vector<8x1xf32> to vector<1x1x8xf32>
    %c0_12 = arith.constant 0 : index
    %c0_13 = arith.constant 0 : index
    %c0_14 = arith.constant 0 : index
    %24 = vector.load %arg6[%c0_12, %c0_13, %c0_14] : memref<1x1x8xf32, #tpu.memory_space<vmem>>, vector<1x1x8xf32>
    tpu.vector_store %arg6[%c0_12, %c0_13, %c0_14], %23 {strides = array<i32>} : memref<1x1x8xf32, #tpu.memory_space<vmem>>, vector<1x1x8xf32>,
    return
  }
  func.func @transform_0(%arg0: i32) -> (i32, i32) {
    %c0_i32 = arith.constant 0 : i32
    %c0_i32_0 = arith.constant 0 : i32
    return %arg0, %c0_i32 : i32, i32
  }
  func.func @transform_1(%arg0: i32) -> (i32, i32) {
    %c0_i32 = arith.constant 0 : i32
    %c0_i32_0 = arith.constant 0 : i32
    %c0_i32_1 = arith.constant 0 : i32
    return %c0_i32, %c0_i32_0 : i32, i32
  }
  func.func @transform_2(%arg0: i32) -> (i32, i32) {
    %c0_i32 = arith.constant 0 : i32
    %c0_i32_0 = arith.constant 0 : i32
    %c0_i32_1 = arith.constant 0 : i32
    return %c0_i32, %c0_i32_0 : i32, i32
  }
  func.func @transform_3(%arg0: i32) -> (i32, i32) {
    %c0_i32 = arith.constant 0 : i32
    %c0_i32_0 = arith.constant 0 : i32
    %c0_i32_1 = arith.constant 0 : i32
    return %c0_i32, %c0_i32_0 : i32, i32
  }
  func.func @transform_4(%arg0: i32) -> i32 {
    %c0_i32 = arith.constant 0 : i32
    %c0_i32_0 = arith.constant 0 : i32
    return %c0_i32 : i32
  }
  func.func @transform_5(%arg0: i32) -> (i32, i32, i32) {
    %c0_i32 = arith.constant 0 : i32
    %c0_i32_0 = arith.constant 0 : i32
    %c0_i32_1 = arith.constant 0 : i32
    return %arg0, %c0_i32, %c0_i32_0 : i32, i32, i32
  }
}

</mosaic_0001>

<bundles_post_ra>
// kernel: tpu_custom_call.1
= control target key start
LH: loop header
LB: loop body
LE: loop exit
PB: predicated region body
PF: predicated region fallthrough
CT: control target
= control target key end

     0   :  { %11 = vsyncpa [#allocation4], 0  ;;  %s490_s0 = inlined_call_operand.hbm [shape: bf16[8,256], index: 0, kind: input, shape index: {}]   ;;  %s491_s1 = inlined_call_operand.hbm [shape: bf16[256,128], index: 1, kind: input, shape index: {}]   ;;  %s492_s2 = inlined_call_operand.vmem [shape: f32[1,128], index: 2, kind: input, shape index: {}]   ;;  %s493_s3 = inlined_call_operand.vmem [shape: f32[1,128], index: 3, kind: input, shape index: {}]   ;;  %s494_s4 = inlined_call_operand.<no memory space> [shape: f32[1], index: 4, kind: input, shape index: {}]   ;;  %s495_s5 = inlined_call_operand.hbm [shape: f32[1,1,8], index: 5, kind: output, shape index: {}]  }
   0x1   :  { %12 = vsyncpa [#allocation7], 0 }
   0x2   :  { %13 = vsyncpa [#allocation5], 0  ;;  %s19_s20 = sshll.u32 %s490_s0, 4  ;;  %s437_s21 = smov [#allocation3]   ;;  %s20_s20 = int_to_ptr.hbm [resolvable:$true] %s19_s20 }
   0x3   :  { %s21_s22 = sshll.u32 %s437_s21, 4  ;;  %s29_s25 = sshll.u32 %s491_s1, 4  ;;  %s22_s22 = int_to_ptr.vmem [resolvable:$true] %s21_s22  ;;  %s30_s25 = int_to_ptr.hbm [resolvable:$true] %s29_s25 }
   0x4   :  { %24 = dma.hbm_to_vmem [thread:$0]  %s20_s20, 128, %s22_s22, [#allocation4]  }
   0x5   :  { %s438_s26 = smov [#allocation6]   ;;  %s439_s28 = smov 64  }
   0x6   :  { %s31_s27 = sshll.u32 %s438_s26, 4  ;;  %s440_s29 = smov 4   ;;  %s32_s27 = int_to_ptr.vmem [resolvable:$true] %s31_s27 }
   0x7   :  { %37 = dma.hbm_to_vmem [thread:$0]  %s30_s25, 2048, %s32_s27, [#allocation7], %s439_s28, %s439_s28, %s440_s29  }
   0x8   :  { %431 = dma.done.wait [#allocation4], 128  }
   0x9   :  { %432 = vsyncadd [#allocation4], 4294967168 }
   0xa   :  { %433 = dma.done.wait [#allocation7], 2048  }
   0xb   :  { %434 = vsyncadd [#allocation7], 4294965248  ;;  %v339_v0 = vld [vmem:[#allocation6 + $0x38] sm:$0xff]  ;;  %v338_v2 = vld [vmem:[#allocation6 + $0x30] sm:$0xff]  ;;  %v227_v31 = vstv %s494_s4  ;;  %v244_v40 = vlaneseq  ;;  %s257_s10 = sshll.u32 %s495_s5, 4  ;;  %vm248_vm2 = vcmask 57344   ;;  %s258_s10 = int_to_ptr.hbm [resolvable:$true] %s257_s10 }
   0xc   :  { %v347_v1 = vld [vmem:[#allocation6 + $0x78] sm:$0xff]  ;;  %192 = vmatpush.bf16.msra.mxu0 %v339_v0  ;;  %v346_v3 = vld [vmem:[#allocation6 + $0x70] sm:$0xff]  ;;  %v337_v4 = vld [vmem:[#allocation6 + $0x28] sm:$0xff] }
   0xd   :  { %205 = vmatpush.bf16.msra.mxu1 %v347_v1  ;;  %v345_v5 = vld [vmem:[#allocation6 + $0x68] sm:$0xff]  ;;  %v336_v6 = vld [vmem:[#allocation6 + $0x20] sm:$0xff]  ;;  %v335_v8 = vld [vmem:[#allocation6 + $0x18] sm:$0xff]  ;;  %v245_v45 = vand.u32 127, %v244_v40 }
   0xe   :  { %v344_v7 = vld [vmem:[#allocation6 + $0x60] sm:$0xff]  ;;  %v343_v9 = vld [vmem:[#allocation6 + $0x58] sm:$0xff]  ;;  %v334_v10 = vld [vmem:[#allocation6 + $0x10] sm:$0xff] }
   0xf   :  { %v342_v11 = vld [vmem:[#allocation6 + $0x50] sm:$0xff]  ;;  %v333_v12 = vld [vmem:[#allocation6 + $0x8] sm:$0xff]  ;;  %v52_v14 = vld [vmem:[#allocation3] sm:$0xff] }
  0x10   :  { %193 = vmatpush.bf16.msra.mxu0 %v338_v2  ;;  %v341_v13 = vld [vmem:[#allocation6 + $0x48] sm:$0xff]  ;;  %v90_v15 = vunpack.c.l.b16 %v52_v14  ;;  %v91_v16 = vunpack.c.h.b16 %v52_v14  ;;  %v332_v17 = vld [vmem:[#allocation6] sm:$0xff]  ;;  %v353_v21 = vld [vmem:[%s492_s2] ss:$0 sm:$0xff]  ;;  %s441_s2 = smov [#allocation8]  }
  0x11   :  { %206 = vmatpush.bf16.msra.mxu1 %v346_v3  ;;  %v340_v18 = vld [vmem:[#allocation6 + $0x40] sm:$0xff]  ;;  %v354_v26 = vld [vmem:[%s493_s3] ss:$0 sm:$0xff]  ;;  %s255_s3 = sshll.u32 %s441_s2, 4  ;;  %s256_s3 = int_to_ptr.vmem [resolvable:$true] %s255_s3 }
  0x12   :  { %v92_v19 = vpack.c.b16 %v90_v15, %v90_v15  ;;  %v93_v20 = vpack.c.b16 %v91_v16, %v91_v16 }
  0x14   :  { %194 = vmatpush.bf16.msra.mxu0 %v337_v4 }
  0x15   :  { %207 = vmatpush.bf16.msra.mxu1 %v345_v5 }
  0x18   :  { %195 = vmatpush.bf16.msra.mxu0 %v336_v6 }
  0x19   :  { %208 = vmatpush.bf16.msra.mxu1 %v344_v7 }
  0x1c   :  { %196 = vmatpush.bf16.msra.mxu0 %v335_v8 }
  0x1d   :  { %209 = vmatpush.bf16.msra.mxu1 %v343_v9 }
  0x20   :  { %197 = vmatpush.bf16.msra.mxu0 %v334_v10 }
  0x21   :  { %210 = vmatpush.bf16.msra.mxu1 %v342_v11 }
  0x24   :  { %198 = vmatpush.bf16.msra.mxu0 %v333_v12 }
  0x25   :  { %211 = vmatpush.bf16.msra.mxu1 %v341_v13 }
  0x28   :  { %199 = vmatpush.bf16.msra.mxu0 %v332_v17 }
  0x29   :  { %212 = vmatpush.bf16.msra.mxu1 %v340_v18 }
  0x2b   :  { %200 = vmatmul.bf16.vlgmr.msra.gmra.mxu0 %v92_v19 }
  0x2c   :  { %213 = vmatmul.bf16.vlgmr.msra.gmra.mxu1 %v93_v20 }
  0xa8   :  { %v201_v22 = vpop.f32.mrf.mxu0 }
  0xa9   :  { %v214_v23 = vpop.f32.mrf.mxu1  ;;  %v202_v24 = vadd.f32 %v353_v21, %v201_v22 }
  0xab   :  { %v215_v25 = vadd.f32 %v214_v23, %v202_v24 }
  0xad   :  { %v218_v27 = vmax.f32 %v215_v25, 0.0 }
  0xaf   :  { %v223_v28 = vmul.f32 %v354_v26, %v218_v27 }
  0xb0   :  { %v203_v29 = vpop.f32.mrf.mxu0 }
  0xb1   :  { %v216_v30 = vpop.f32.mrf.mxu1  ;;  %224 = vadd.xlane.f32.xlu0 %v223_v28 }
 0x124   :  { %v225_v32 = vpop.xlane.xlu0 %224 }
 0x125   :  { %v228_v33 = vadd.f32 %v227_v31, %v225_v32 }
 0x127   :  { %v230_v34 = vmin.f32 %v228_v33, 20.0  ;;  %vm229_vm1 = vcmp.gt.f32.partialorder %v228_v33, 20.0 }
 0x129   :  { %v231_v35 = vmul.f32 1.442695, %v230_v34 }
 0x12b   :  { %355 = vpow2.f32 %v231_v35 }
 0x131   :  { %v356_v36 = vpop.eup %355 }
 0x132   :  { %v233_v37 = vadd.f32 1.0, %v356_v36  ;;  %v236_v38 = vmul.f32 -0.5, %v356_v36  ;;  %v239_v41 = vand.u32 2147483647, %v356_v36 }
 0x134   :  { %357 = vlog2.f32 %v233_v37  ;;  %v237_v39 = vadd.f32 1.0, %v236_v38  ;;  %vm240_vm0 = vcmp.lt.f32.partialorder %v239_v41, 0.0004427343 }
 0x136   :  { %v238_v44 = vmul.f32 %v356_v36, %v237_v39 }
 0x13a   :  { %v358_v42 = vpop.eup %357 }
 0x13b   :  { %v235_v43 = vmul.f32 0.6931472, %v358_v42 }
 0x13d   :  { %v241_v46 = vsel %vm240_vm0, %v238_v44, %v235_v43 }
 0x13e   :  { %v242_v47 = vsel %vm229_vm1, %v228_v33, %v241_v46 }
 0x13f   :  { %v246_v48 = vperm.slane %v242_v47, %v245_v45 }
 0x141   :  { %249 = vst.msk [vmem:[#allocation8] sm:$0x1] %vm248_vm2, %v246_v48 }
 0x142   :  { %260 = dma.vmem_to_hbm [thread:$0]  %s256_s3, 16, %s258_s10, [#allocation5]  }
 0x143   :  { %435 = dma.done.wait [#allocation5], 16  }
 0x144   :  { %436 = vsyncadd [#allocation5], 4294967280 }
 0x145   :  { %265 = vsyncpa [#allocation4], 1 }
 0x146   :  { %266 = vsyncpa [#allocation7], 1 }
 0x147   :  { %267 = vsyncpa [#allocation5], 1 }

</bundles_post_ra>
